<compile_context>
chip_gen: v7x
topology: tpu7x:2x2x1
jax: 0.10.0
libtpu: 0.0.40
codegen_flags: <defaults>
</compile_context>

<pallas_src>
import jax
import jax.numpy as jnp
from jax import lax
from jax.experimental import pallas as pl
from jax.experimental.pallas import tpu as pltpu


def _round_up(n, m):
    return ((n + m - 1) // m) * m


def net_kernel(x_ref, w_ref, fcw_ref, fcb_ref, o_ref):
    # x_ref  : (TB, D) f32 VMEM  -- one row tile of the flattened input
    # w_ref  : (1, D)  f32 VMEM  -- W parameter, flattened (|.| taken here)
    # fcw_ref: (1, D)  f32 VMEM  -- fc1 weight row, flattened
    # fcb_ref: (1, 1)  f32 SMEM  -- fc1 bias (scalar)
    # o_ref  : (1, TB) f32 VMEM  -- lane-dense output row for this tile
    # Fold |W| into the fc1 weight once: (1, D) multiply instead of (TB, D).
    v = jnp.abs(w_ref[...]) * fcw_ref[...]
    # Contract over D with v on the LHS: (1, D) . (TB, D) -> (1, TB).
    # No ".T" on either operand; output is lane-dense so the store is an
    # unmasked vst rather than a masked last-dim-1 store.
    acc = lax.dot_general(
        v,
        x_ref[...],
        dimension_numbers=(((1,), (1,)), ((), ())),
        preferred_element_type=jnp.float32,
    )
    o_ref[...] = acc + fcb_ref[0, 0]


def net_forward(x, W, fc1_w, fc1_b, *, block_b=1024):
    """Forward pass of `Net`.

    x: (B, num_tf, num_peak); W: (num_tf, num_peak);
    fc1_w: (1, num_tf*num_peak); fc1_b: (1,).  Returns (B, 1).
    """
    B, num_tf, num_peak = x.shape
    D = num_tf * num_peak

    x_flat = x.reshape(B, D).astype(jnp.float32)
    w_flat = W.reshape(1, D).astype(jnp.float32)
    fcw = fc1_w.reshape(1, D).astype(jnp.float32)
    fcb = fc1_b.reshape(1, 1).astype(jnp.float32)

    # Row tile: multiple of 8 sublanes, capped so double-buffered x tiles stay
    # small even on v7x's 64 MiB VMEM (TB=1024, D=128 -> ~1 MiB of buffers).
    tb = min(block_b, _round_up(B, 8))
    b_pad = _round_up(B, tb)
    if b_pad != B:
        x_flat = jnp.pad(x_flat, ((0, b_pad - B), (0, 0)))
    grid = (b_pad // tb,)

    out = pl.pallas_call(
        net_kernel,
        out_shape=jax.ShapeDtypeStruct((1, b_pad), jnp.float32),
        grid=grid,
        in_specs=[
            pl.BlockSpec((tb, D), lambda i: (i, 0)),             # x row tile
            pl.BlockSpec((1, D), lambda i: (0, 0)),              # W (resident)
            pl.BlockSpec((1, D), lambda i: (0, 0)),              # fc1 weight
            pl.BlockSpec(memory_space=pltpu.MemorySpace.SMEM),   # fc1 bias scalar
        ],
        out_specs=pl.BlockSpec((1, tb), lambda i: (0, i)),       # lane-dense out
        compiler_params=pltpu.CompilerParams(
            dimension_semantics=("parallel",),   # shard B tiles across TCs (v7x)
        ),
        cost_estimate=pl.CostEstimate(
            flops=2 * b_pad * D,
            transcendentals=0,
            bytes_accessed=4 * (b_pad * D + 2 * D + 1 + b_pad),
        ),
    )(x_flat, w_flat, fcw, fcb)

    # Undo the lane-dense layout: (1, b_pad) -> (B, 1) for callers.
    return out[0, :B].reshape(B, 1)


def _reference(x, W, fc1_w, fc1_b):
    B = x.shape[0]
    return (x * jnp.abs(W)[None, :, :]).reshape(B, -1) @ fc1_w.T + fc1_b


if __name__ == "__main__":
    key = jax.random.PRNGKey(0)
    kx, kW, kfw, kfb, kx2 = jax.random.split(key, 5)

    # Small shapes consistent with the module: x is (batch, num_tf, num_peak).
    batch, num_tf, num_peak = 8, 4, 32
    D = num_tf * num_peak

    x = jax.random.normal(kx, (batch, num_tf, num_peak), dtype=jnp.float32)
    W = jax.random.normal(kW, (num_tf, num_peak), dtype=jnp.float32)
    fc1_w = jax.random.normal(kfw, (1, D), dtype=jnp.float32) * 0.05
    fc1_b = jax.random.normal(kfb, (1,), dtype=jnp.float32) * 0.05

    out = net_forward(x, W, fc1_w, fc1_b)
    jax.block_until_ready(out)
    ref = _reference(x, W, fc1_w, fc1_b)
    assert out.shape == (batch, 1)
    assert jnp.allclose(out, ref, atol=1e-5, rtol=1e-5)

    # Also exercise the tiled, padded multi-block path (B > one row tile).
    big_batch = 2560
    x2 = jax.random.normal(kx2, (big_batch, num_tf, num_peak), dtype=jnp.float32)
    out2 = net_forward(x2, W, fc1_w, fc1_b)
    jax.block_until_ready(out2)
    ref2 = _reference(x2, W, fc1_w, fc1_b)
    assert out2.shape == (big_batch, 1)
    assert jnp.allclose(out2, ref2, atol=1e-4, rtol=1e-4)

    print("KERNEL_OK")
</pallas_src>

<mosaic_0001>
module attributes {stable_mosaic.version = 11 : i64} {
  func.func @net_kernel(%arg0: i32, %arg1: memref<8x128xf32, #tpu.memory_space<vmem>>, %arg2: memref<1x128xf32, #tpu.memory_space<vmem>>, %arg3: memref<1x128xf32, #tpu.memory_space<vmem>>, %arg4: memref<1x1xf32, #tpu.memory_space<smem>>, %arg5: memref<1x8xf32, #tpu.memory_space<vmem>>) attributes {dimension_semantics = [#tpu.dimension_semantics<parallel>], iteration_bounds = array<i64: 1>, scalar_prefetch = 0 : i64, scratch_operands = 0 : i64, tpu.core_type = #tpu.core_type<tc>, window_params = [{transform_indices = @transform_0, window_bounds = array<i64: 8, 128>}, {pipeline_mode = #tpu.pipeline_mode<synchronous>, transform_indices = @transform_1, window_bounds = array<i64: 1, 128>}, {pipeline_mode = #tpu.pipeline_mode<synchronous>, transform_indices = @transform_2, window_bounds = array<i64: 1, 128>}, {transform_indices = @transform_3, window_bounds = array<i64: 1, 1>}, {transform_indices = @transform_4, window_bounds = array<i64: 1, 8>}]} {
    %c0 = arith.constant 0 : index
    %c0_0 = arith.constant 0 : index
    %0 = vector.load %arg2[%c0, %c0_0] : memref<1x128xf32, #tpu.memory_space<vmem>>, vector<1x128xf32>
    %1 = math.absf %0 : vector<1x128xf32>
    %c0_1 = arith.constant 0 : index
    %c0_2 = arith.constant 0 : index
    %2 = vector.load %arg3[%c0_1, %c0_2] : memref<1x128xf32, #tpu.memory_space<vmem>>, vector<1x128xf32>
    %3 = arith.mulf %1, %2 : vector<1x128xf32>
    %c0_3 = arith.constant 0 : index
    %c0_4 = arith.constant 0 : index
    %4 = vector.load %arg1[%c0_3, %c0_4] : memref<8x128xf32, #tpu.memory_space<vmem>>, vector<8x128xf32>
    %cst = arith.constant dense<0.000000e+00> : vector<1x8xf32>
    %5 = tpu.matmul %3, %4, %cst {dimension_numbers = #tpu.dot_dimension_numbers<[1], [1], [0], [0], [0, 0, 1, 0], [], []>} : vector<1x128xf32>, vector<8x128xf32>, vector<1x8xf32> -> vector<1x8xf32>
    %c0_5 = arith.constant 0 : index
    %c0_6 = arith.constant 0 : index
    %6 = memref.load %arg4[%c0_5, %c0_6] : memref<1x1xf32, #tpu.memory_space<smem>>
    %7 = vector.broadcast %6 : f32 to vector<1x8xf32>
    %8 = arith.addf %5, %7 : vector<1x8xf32>
    %c0_7 = arith.constant 0 : index
    %c0_8 = arith.constant 0 : index
    %9 = vector.load %arg5[%c0_7, %c0_8] : memref<1x8xf32, #tpu.memory_space<vmem>>, vector<1x8xf32>
    tpu.vector_store %arg5[%c0_7, %c0_8], %8 {strides = array<i32>} : memref<1x8xf32, #tpu.memory_space<vmem>>, vector<1x8xf32>,
    return
  }
  func.func @transform_0(%arg0: i32) -> (i32, i32) {
    %c0_i32 = arith.constant 0 : i32
    %c0_i32_0 = arith.constant 0 : i32
    return %arg0, %c0_i32 : i32, i32
  }
  func.func @transform_1(%arg0: i32) -> (i32, i32) {
    %c0_i32 = arith.constant 0 : i32
    %c0_i32_0 = arith.constant 0 : i32
    %c0_i32_1 = arith.constant 0 : i32
    return %c0_i32, %c0_i32_0 : i32, i32
  }
  func.func @transform_2(%arg0: i32) -> (i32, i32) {
    %c0_i32 = arith.constant 0 : i32
    %c0_i32_0 = arith.constant 0 : i32
    %c0_i32_1 = arith.constant 0 : i32
    return %c0_i32, %c0_i32_0 : i32, i32
  }
  func.func @transform_3(%arg0: i32) -> (i32, i32) {
    %c0_i32 = arith.constant 0 : i32
    %c0_i32_0 = arith.constant 0 : i32
    %c0_i32_1 = arith.constant 0 : i32
    return %c0_i32, %c0_i32_0 : i32, i32
  }
  func.func @transform_4(%arg0: i32) -> (i32, i32) {
    %c0_i32 = arith.constant 0 : i32
    %c0_i32_0 = arith.constant 0 : i32
    return %c0_i32, %arg0 : i32, i32
  }
}

</mosaic_0001>

<bundles_post_ra>
// kernel: tpu_custom_call.1
= control target key start
LH: loop header
LB: loop body
LE: loop exit
PB: predicated region body
PF: predicated region fallthrough
CT: control target
= control target key end

     0   :  { %10 = vsyncpa [#allocation4], 0  ;;  %s246_s0 = inlined_call_operand.hbm [shape: f32[8,128], index: 0, kind: input, shape index: {}]   ;;  %s247_s1 = inlined_call_operand.vmem [shape: f32[1,128], index: 1, kind: input, shape index: {}]   ;;  %s248_s2 = inlined_call_operand.vmem [shape: f32[1,128], index: 2, kind: input, shape index: {}]   ;;  %s249_s3 = inlined_call_operand.<no memory space> [shape: f32[1,1], index: 3, kind: input, shape index: {}]   ;;  %s250_s4 = inlined_call_operand.hbm [shape: f32[1,8], index: 4, kind: output, shape index: {}]  }
   0x1   :  { %11 = vsyncpa [#allocation5], 0  ;;  %s184_s15 = smov [#allocation3]   ;;  %s136_s19 = scalar_lea.hbm %s246_s0, 128 }
   0x2   :  { %s18_s16 = sshll.u32 %s184_s15, 4  ;;  %p137_p0 = scmp.ne.s32.totalorder %s246_s0, %s136_s19  ;;  %s19_s16 = int_to_ptr.vmem [resolvable:$true] %s18_s16 }
   0x3   :  { %p140_p1 = scmp.lt.u32.totalorder %s136_s19, %s246_s0 }
   0x5   :  { %p142_p2 = pnand %p140_p1, %p137_p0 }
   0x7   :  { %145 = shalt.err (!%p142_p2)
}
   0x8   :  { %s146_s24 = scalar_lea.vmem %s19_s16, 128  ;;  %p151_p4 = scmp.lt.s32.totalorder %s19_s16, %s19_s16 }
   0x9   :  { %p147_p3 = scmp.ne.s32.totalorder %s19_s16, %s146_s24  ;;  %p152_p5 = scmp.lt.s32.totalorder %s146_s24, %s146_s24 }
   0xb   :  { %p153_p6 = por %p152_p5, %p151_p4 }
   0xd   :  { %p154_p7 = pnand %p153_p6, %p147_p3 }
   0xf   :  { %157 = shalt.err (!%p154_p7)
}
  0x10   :  { %21 = dma.hbm_to_vmem [thread:$0]  %s246_s0, 128, %s19_s16, [#allocation4]  }
  0x11   :  { %180 = dma.done.wait [#allocation4], 128  }
  0x12   :  { %181 = vsyncadd [#allocation4], 4294967168  ;;  %v185_v0 = vmov 0.0   ;;  %vm186_vm0 = vmmov 0   ;;  %v35_v1 = vld [vmem:[#allocation3] sm:$0xff]  ;;  %v37_v6 = vstv %s249_s3  ;;  %s187_s6 = smov [#allocation6]  }
  0x13   :  { %127 = vmatprep.subr.mxu0 %v185_v0  ;;  %129 = vmatprep.mubr.msk.f32.mxu0 %vm186_vm0, %v185_v0  ;;  %v31_v2 = vld [vmem:[%s247_s1] sm:$0x1]  ;;  %s116_s7 = sshll.u32 %s187_s6, 4  ;;  %vm108_vm1 = vcmask 57344   ;;  %s117_s7 = int_to_ptr.vmem [resolvable:$true] %s116_s7 }
  0x14   :  { %v33_v3 = vld [vmem:[%s248_s2] sm:$0x1]  ;;  %128 = vmatpush3.xpose.msra.mxu0 %v35_v1  ;;  %v32_v4 = vand.u32 2147483647, %v31_v2  ;;  %s158_s1 = scalar_lea.vmem %s117_s7, 16  ;;  %s162_s8 = scalar_lea.vmem %s117_s7, 32 }
  0x15   :  { %p159_p8 = scmp.ne.s32.totalorder %s117_s7, %s158_s1  ;;  %p163_p9 = scmp.lt.s32.totalorder %s117_s7, %s117_s7 }
  0x16   :  { %v34_v5 = vmul.f32 %v33_v3, %v32_v4  ;;  %p164_p10 = scmp.lt.s32.totalorder %s162_s8, %s158_s1 }
  0x18   :  { %130 = vmatmul.mubr.f32.vlgmr.msra.gmra.mrb[0].mxu0 %v34_v5  ;;  %p165_p11 = por %p164_p10, %p163_p9 }
  0x1a   :  { %p166_p12 = pnand %p165_p11, %p159_p8 }
  0xeb   :  { %v104_v7 = vpop.f32.mrb[0].mxu0 }
  0xec   :  { %v105_v8 = vadd.f32 %v104_v7, %v37_v6  ;;  %v131_v9 = vpop.f32.mrb[1].mxu0 }
  0xee   :  { %109 = vst.msk [vmem:[#allocation6] sm:$0x1] %vm108_vm1, %v105_v8 }
  0xef   :  { %169 = shalt.err (!%p166_p12)
}
  0xf0   :  { %s170_s3 = scalar_lea.hbm %s250_s4, 16 }
  0xf1   :  { %p171_p13 = scmp.ne.s32.totalorder %s250_s4, %s170_s3  ;;  %p174_p0 = scmp.lt.u32.totalorder %s170_s3, %s250_s4 }
  0xf3   :  { %p176_p1 = pnand %p174_p0, %p171_p13 }
  0xf5   :  { %179 = shalt.err (!%p176_p1)
}
  0xf6   :  { %119 = dma.vmem_to_hbm [thread:$0]  %s117_s7, 16, %s250_s4, [#allocation5]  }
  0xf7   :  { %182 = dma.done.wait [#allocation5], 16  }
  0xf8   :  { %183 = vsyncadd [#allocation5], 4294967280 }
  0xf9   :  { %123 = vsyncpa [#allocation4], 1 }
  0xfa   :  { %124 = vsyncpa [#allocation5], 1 }

</bundles_post_ra>
